<compile_context>
chip_gen: v7x
topology: tpu7x:2x2x1
jax: 0.10.0
libtpu: 0.0.40
codegen_flags: <defaults>
</compile_context>

<pallas_src>
import functools

import jax
import jax.numpy as jnp
from jax import lax
from jax.experimental import pallas as pl
from jax.experimental.pallas import tpu as pltpu

LANE = 128
_STATIC_UNROLL_LIMIT = 8


def _accum_c_block(x_ref, sum_acc, max_acc, cs, n_full, rem, acc_lanes,
                   max_dtype):
    """Accumulate one C-block of the current HW tile into the scratch refs."""
    if n_full > 0:
        s = sum_acc[:, cs, :]
        m = max_acc[:, cs, :]
        if n_full <= _STATIC_UNROLL_LIMIT:
            for g in range(n_full):
                ch = x_ref[:, cs, g * acc_lanes:(g + 1) * acc_lanes]
                s = s + ch.astype(jnp.float32)
                m = jnp.maximum(m, ch.astype(max_dtype))
        else:
            def body(g, carry):
                s_c, m_c = carry
                lo = pl.multiple_of(g * acc_lanes, acc_lanes)
                ch = x_ref[:, cs, pl.ds(lo, acc_lanes)]
                return (s_c + ch.astype(jnp.float32),
                        jnp.maximum(m_c, ch.astype(max_dtype)))
            s, m = lax.fori_loop(0, n_full, body, (s, m), unroll=4)
        sum_acc[:, cs, :] = s
        max_acc[:, cs, :] = m
    if rem > 0:
        # Static slice over only the valid remainder lanes -> no masking, no
        # splats, and out-of-bounds (padded) lanes of the block are never read.
        off = n_full * acc_lanes
        ch = x_ref[:, cs, off:off + rem]
        sum_acc[:, cs, :rem] = sum_acc[:, cs, :rem] + ch.astype(jnp.float32)
        max_acc[:, cs, :rem] = jnp.maximum(max_acc[:, cs, :rem],
                                           ch.astype(max_dtype))


def _accum_tile(x_ref, sum_acc, max_acc, valid, *, C, c_block, acc_lanes,
                max_dtype):
    n_full = valid // acc_lanes
    rem = valid % acc_lanes
    for c_lo in range(0, C, c_block):
        cs = slice(c_lo, min(c_lo + c_block, C))
        _accum_c_block(x_ref, sum_acc, max_acc, cs, n_full, rem, acc_lanes,
                       max_dtype)


def _channel_attention_kernel(x_ref, w1_ref, b1_ref, w2_ref, b2_ref, o_ref,
                              sum_acc, max_acc, *, hw, tile_hw, acc_lanes,
                              num_hw_tiles, C, c_block, b_tile, max_dtype):
    h = pl.program_id(1)
    last = num_hw_tiles - 1

    @pl.when(h == 0)
    def _init():
        sum_acc[...] = jnp.zeros_like(sum_acc)
        max_acc[...] = jnp.full_like(max_acc, -jnp.inf)

    remainder = hw - last * tile_hw  # valid lanes in the last tile (static)

    def accum(valid):
        _accum_tile(x_ref, sum_acc, max_acc, valid, C=C, c_block=c_block,
                    acc_lanes=acc_lanes, max_dtype=max_dtype)

    if num_hw_tiles == 1:
        accum(hw)
    elif remainder == tile_hw:
        accum(tile_hw)
    else:
        @pl.when(h < last)
        def _full_tiles():
            accum(tile_hw)

        @pl.when(h == last)
        def _ragged_tile():
            accum(remainder)

    @pl.when(h == last)
    def _finalize():
        avg = jnp.sum(sum_acc[...], axis=-1) * (1.0 / hw)          # (b_tile, C)
        mx = jnp.max(max_acc[...], axis=-1).astype(jnp.float32)    # (b_tile, C)

        w1 = w1_ref[...].astype(jnp.float32)
        b1 = b1_ref[...].astype(jnp.float32)
        w2 = w2_ref[...].astype(jnp.float32)
        b2 = b2_ref[...].astype(jnp.float32)

        # Fuse both pooling branches into one pair of matmuls.
        v = jnp.concatenate([avg, mx], axis=0)                     # (2*b_tile, C)
        hidden = jnp.maximum(
            jnp.dot(v, w1, preferred_element_type=jnp.float32) + b1, 0.0)
        out2 = jnp.dot(hidden, w2, preferred_element_type=jnp.float32) + b2
        out = jax.nn.sigmoid(out2[:b_tile] + out2[b_tile:])        # (b_tile, C)
        o_ref[...] = out.reshape(b_tile, 1, C).astype(o_ref.dtype)


def _choose_c_block(C, b_tile):
    """Bound accumulator vreg pressure: b_tile * c_block <= ~128 rows."""
    target = max(8, 128 // max(1, b_tile))
    if C <= target:
        return C
    for d in range(min(target, C), 7, -1):
        if C % d == 0 and d % 8 == 0:
            return d
    for d in range(min(target, C), 0, -1):
        if C % d == 0:
            return d
    return C


def channel_attention(x, w1, b1, w2, b2, *, b_tile=None, tile_hw=None):
    """x: (B, C, H, W) NCHW.  Returns sigmoid attention weights (B, C, 1, 1)."""
    B, C, H, W = x.shape
    hw = H * W
    itemsize = jnp.dtype(x.dtype).itemsize

    if b_tile is None:
        b_tile = min(B, 8)
    b_tile = max(1, min(int(b_tile), B))

    if tile_hw is None:
        budget = 8 * 1024 * 1024                 # bytes per x tile buffer
        per_lane = max(1, b_tile * C * itemsize)
        tile_hw = max(LANE, (budget // per_lane) // LANE * LANE)
    if tile_hw >= hw:
        tile_hw = hw                             # single tile, full extent
    else:
        tile_hw = max(LANE, (tile_hw // LANE) * LANE)
        if tile_hw >= hw:
            tile_hw = hw

    num_hw_tiles = pl.cdiv(hw, tile_hw)
    acc_lanes = min(LANE, tile_hw)
    max_dtype = jnp.bfloat16 if x.dtype == jnp.bfloat16 else jnp.float32
    c_block = _choose_c_block(C, b_tile)

    # Pad the batch to a multiple of b_tile; padded rows are sliced off.
    num_b_tiles = pl.cdiv(B, b_tile)
    B_pad = num_b_tiles * b_tile
    x_flat = x.reshape(B, C, hw)
    if B_pad != B:
        x_flat = jnp.pad(x_flat, ((0, B_pad - B), (0, 0), (0, 0)))

    mid = w1.shape[1]

    kernel = functools.partial(
        _channel_attention_kernel, hw=hw, tile_hw=tile_hw, acc_lanes=acc_lanes,
        num_hw_tiles=num_hw_tiles, C=C, c_block=c_block, b_tile=b_tile,
        max_dtype=max_dtype)

    x_tile_bytes = b_tile * C * tile_hw * itemsize
    scratch_bytes = b_tile * C * acc_lanes * (4 + jnp.dtype(max_dtype).itemsize)
    w_bytes = (w1.size + b1.size + w2.size + b2.size) * jnp.dtype(
        w1.dtype).itemsize
    vmem_limit = int(
        min(max(3 * x_tile_bytes + scratch_bytes + 2 * w_bytes + (4 << 20),
                32 << 20), 48 << 20))

    cost = pl.CostEstimate(
        flops=8 * B_pad * C * mid,
        transcendentals=2 * B_pad * C,
        bytes_accessed=x_flat.size * itemsize + B_pad * C * itemsize + w_bytes,
    )

    grid_spec = pltpu.PrefetchScalarGridSpec(
        num_scalar_prefetch=0,
        grid=(num_b_tiles, num_hw_tiles),
        in_specs=[
            pl.BlockSpec((b_tile, C, tile_hw), lambda b, h: (b, 0, h)),
            pl.BlockSpec(w1.shape, lambda b, h: (0, 0)),   # resident weights
            pl.BlockSpec(b1.shape, lambda b, h: (0, 0)),
            pl.BlockSpec(w2.shape, lambda b, h: (0, 0)),
            pl.BlockSpec(b2.shape, lambda b, h: (0, 0)),
        ],
        out_specs=pl.BlockSpec((b_tile, 1, C), lambda b, h: (b, 0, 0)),
        scratch_shapes=[
            pltpu.VMEM((b_tile, C, acc_lanes), jnp.float32),  # partial sums
            pltpu.VMEM((b_tile, C, acc_lanes), max_dtype),    # running max
        ],
    )

    out = pl.pallas_call(
        kernel,
        out_shape=jax.ShapeDtypeStruct((B_pad, 1, C), x.dtype),
        grid_spec=grid_spec,
        compiler_params=pltpu.CompilerParams(
            dimension_semantics=("parallel", "arbitrary"),
            vmem_limit_bytes=vmem_limit),
        cost_estimate=cost,
    )(x_flat, w1, b1, w2, b2)
    return out[:B].reshape(B, C, 1, 1)


def init_params(key, channels, reduction=16, dtype=jnp.float32):
    """Deterministic synthetic init matching nn.Linear shapes."""
    mid = max(channels // reduction, 8)
    k1, k2, k3, k4 = jax.random.split(key, 4)
    # Weights stored transposed vs torch: (in_features, out_features).
    lim1 = 1.0 / jnp.sqrt(channels)
    lim2 = 1.0 / jnp.sqrt(mid)
    w1 = jax.random.uniform(k1, (channels, mid), dtype, -lim1, lim1)
    b1 = jax.random.uniform(k2, (1, mid), dtype, -lim1, lim1)
    w2 = jax.random.uniform(k3, (mid, channels), dtype, -lim2, lim2)
    b2 = jax.random.uniform(k4, (1, channels), dtype, -lim2, lim2)
    return w1, b1, w2, b2


def reference(x, w1, b1, w2, b2):
    B, C = x.shape[:2]
    avg = jnp.mean(x, axis=(2, 3))
    mx = jnp.max(x, axis=(2, 3))

    def mlp(v):
        return jnp.maximum(v @ w1 + b1, 0.0) @ w2 + b2

    return jax.nn.sigmoid(mlp(avg) + mlp(mx)).reshape(B, C, 1, 1)


if __name__ == "__main__":
    key = jax.random.PRNGKey(0)
    kx, kp, kx2, kx3 = jax.random.split(key, 4)

    B, C, H, W = 2, 4, 16, 16
    x = jax.random.normal(kx, (B, C, H, W), jnp.float32)
    w1, b1, w2, b2 = init_params(kp, C, reduction=16)

    out = jax.block_until_ready(channel_attention(x, w1, b1, w2, b2))
    ref = reference(x, w1, b1, w2, b2)
    assert out.shape == (B, C, 1, 1)
    assert jnp.allclose(out, ref, atol=1e-5, rtol=1e-5), "mismatch vs reference"

    # Tiled + ragged-last-tile path: HW = 576 split into tiles of 256
    # (remainder 64 handled with static slices, no masking).
    x2 = jax.random.normal(kx2, (B, C, 24, 24), jnp.float32)
    out2 = jax.block_until_ready(
        channel_attention(x2, w1, b1, w2, b2, tile_hw=256))
    ref2 = reference(x2, w1, b1, w2, b2)
    assert jnp.allclose(out2, ref2, atol=1e-5, rtol=1e-5), "mismatch (tiled)"

    # Batch-remainder path (B=3 with b_tile=2 -> padded batch) and HW < 128.
    x3 = jax.random.normal(kx3, (3, C, 8, 8), jnp.float32)
    out3 = jax.block_until_ready(
        channel_attention(x3, w1, b1, w2, b2, b_tile=2))
    ref3 = reference(x3, w1, b1, w2, b2)
    assert out3.shape == (3, C, 1, 1)
    assert jnp.allclose(out3, ref3, atol=1e-5, rtol=1e-5), "mismatch (b pad)"

    print("KERNEL_OK")
</pallas_src>

<mosaic_0001>
module attributes {stable_mosaic.version = 11 : i64} {
  func.func @_channel_attention_kernel(%arg0: i32, %arg1: i32, %arg2: memref<2x4x256xf32, #tpu.memory_space<vmem>>, %arg3: memref<4x8xf32, #tpu.memory_space<vmem>>, %arg4: memref<1x8xf32, #tpu.memory_space<vmem>>, %arg5: memref<8x4xf32, #tpu.memory_space<vmem>>, %arg6: memref<1x4xf32, #tpu.memory_space<vmem>>, %arg7: memref<2x1x4xf32, #tpu.memory_space<vmem>>, %arg8: memref<2x4x128xf32, #tpu.memory_space<vmem>>, %arg9: memref<2x4x128xf32, #tpu.memory_space<vmem>>) attributes {dimension_semantics = [#tpu.dimension_semantics<parallel>, #tpu.dimension_semantics<arbitrary>], iteration_bounds = array<i64: 1, 1>, scalar_prefetch = 0 : i64, scratch_operands = 2 : i64, tpu.core_type = #tpu.core_type<tc>, window_params = [{transform_indices = @transform_0, window_bounds = array<i64: 2, 4, 256>}, {pipeline_mode = #tpu.pipeline_mode<synchronous>, transform_indices = @transform_1, window_bounds = array<i64: 4, 8>}, {pipeline_mode = #tpu.pipeline_mode<synchronous>, transform_indices = @transform_2, window_bounds = array<i64: 1, 8>}, {pipeline_mode = #tpu.pipeline_mode<synchronous>, transform_indices = @transform_3, window_bounds = array<i64: 8, 4>}, {pipeline_mode = #tpu.pipeline_mode<synchronous>, transform_indices = @transform_4, window_bounds = array<i64: 1, 4>}, {transform_indices = @transform_5, window_bounds = array<i64: 2, 1, 4>}]} {
    %c0_i32 = arith.constant 0 : i32
    %0 = arith.cmpi eq, %arg1, %c0_i32 : i32
    %1 = arith.extui %0 : i1 to i32
    %c0_i32_0 = arith.constant 0 : i32
    %2 = arith.cmpi ne, %1, %c0_i32_0 : i32
    scf.if %2 {
      %cst = arith.constant 0.000000e+00 : f32
      %16 = vector.broadcast %cst : f32 to vector<2x4x128xf32>
      %c0_19 = arith.constant 0 : index
      %c0_20 = arith.constant 0 : index
      %c0_21 = arith.constant 0 : index
      %17 = vector.load %arg8[%c0_19, %c0_20, %c0_21] : memref<2x4x128xf32, #tpu.memory_space<vmem>>, vector<2x4x128xf32>
      tpu.vector_store %arg8[%c0_19, %c0_20, %c0_21], %16 {strides = array<i32>} : memref<2x4x128xf32, #tpu.memory_space<vmem>>, vector<2x4x128xf32>,
      %cst_22 = arith.constant 0xFF800000 : f32
      %18 = vector.broadcast %cst_22 : f32 to vector<2x4x128xf32>
      %c0_23 = arith.constant 0 : index
      %c0_24 = arith.constant 0 : index
      %c0_25 = arith.constant 0 : index
      %19 = vector.load %arg9[%c0_23, %c0_24, %c0_25] : memref<2x4x128xf32, #tpu.memory_space<vmem>>, vector<2x4x128xf32>
      tpu.vector_store %arg9[%c0_23, %c0_24, %c0_25], %18 {strides = array<i32>} : memref<2x4x128xf32, #tpu.memory_space<vmem>>, vector<2x4x128xf32>,
    } else {
    }
    %c0 = arith.constant 0 : index
    %c0_1 = arith.constant 0 : index
    %c0_2 = arith.constant 0 : index
    %3 = vector.load %arg8[%c0, %c0_1, %c0_2] : memref<2x4x128xf32, #tpu.memory_space<vmem>>, vector<2x4x128xf32>
    %c0_3 = arith.constant 0 : index
    %c0_4 = arith.constant 0 : index
    %c0_5 = arith.constant 0 : index
    %4 = vector.load %arg9[%c0_3, %c0_4, %c0_5] : memref<2x4x128xf32, #tpu.memory_space<vmem>>, vector<2x4x128xf32>
    %c0_6 = arith.constant 0 : index
    %c0_7 = arith.constant 0 : index
    %c0_8 = arith.constant 0 : index
    %5 = vector.load %arg2[%c0_6, %c0_7, %c0_8] : memref<2x4x256xf32, #tpu.memory_space<vmem>>, vector<2x4x128xf32>
    %6 = arith.addf %3, %5 : vector<2x4x128xf32>
    %7 = arith.maximumf %4, %5 : vector<2x4x128xf32>
    %c0_9 = arith.constant 0 : index
    %c0_10 = arith.constant 0 : index
    %c128 = arith.constant 128 : index
    %8 = vector.load %arg2[%c0_9, %c0_10, %c128] : memref<2x4x256xf32, #tpu.memory_space<vmem>>, vector<2x4x128xf32>
    %9 = arith.addf %6, %8 : vector<2x4x128xf32>
    %10 = arith.maximumf %7, %8 : vector<2x4x128xf32>
    %c0_11 = arith.constant 0 : index
    %c0_12 = arith.constant 0 : index
    %c0_13 = arith.constant 0 : index
    %11 = vector.load %arg8[%c0_11, %c0_12, %c0_13] : memref<2x4x128xf32, #tpu.memory_space<vmem>>, vector<2x4x128xf32>
    tpu.vector_store %arg8[%c0_11, %c0_12, %c0_13], %9 {strides = array<i32>} : memref<2x4x128xf32, #tpu.memory_space<vmem>>, vector<2x4x128xf32>,
    %c0_14 = arith.constant 0 : index
    %c0_15 = arith.constant 0 : index
    %c0_16 = arith.constant 0 : index
    %12 = vector.load %arg9[%c0_14, %c0_15, %c0_16] : memref<2x4x128xf32, #tpu.memory_space<vmem>>, vector<2x4x128xf32>
    tpu.vector_store %arg9[%c0_14, %c0_15, %c0_16], %10 {strides = array<i32>} : memref<2x4x128xf32, #tpu.memory_space<vmem>>, vector<2x4x128xf32>,
    %c0_i32_17 = arith.constant 0 : i32
    %13 = arith.cmpi eq, %arg1, %c0_i32_17 : i32
    %14 = arith.extui %13 : i1 to i32
    %c0_i32_18 = arith.constant 0 : i32
    %15 = arith.cmpi ne, %14, %c0_i32_18 : i32
    scf.if %15 {
      %c0_19 = arith.constant 0 : index
      %c0_20 = arith.constant 0 : index
      %c0_21 = arith.constant 0 : index
      %16 = vector.load %arg8[%c0_19, %c0_20, %c0_21] : memref<2x4x128xf32, #tpu.memory_space<vmem>>, vector<2x4x128xf32>
      %cst = arith.constant dense<0.000000e+00> : vector<2x4xf32>
      %17 = vector.multi_reduction <add>, %16, %cst [2] : vector<2x4x128xf32> to vector<2x4xf32>
      %cst_22 = arith.constant 3.906250e-03 : f32
      %18 = vector.broadcast %cst_22 : f32 to vector<2x4xf32>
      %19 = arith.mulf %17, %18 : vector<2x4xf32>
      %c0_23 = arith.constant 0 : index
      %c0_24 = arith.constant 0 : index
      %c0_25 = arith.constant 0 : index
      %20 = vector.load %arg9[%c0_23, %c0_24, %c0_25] : memref<2x4x128xf32, #tpu.memory_space<vmem>>, vector<2x4x128xf32>
      %cst_26 = arith.constant dense<0xFF800000> : vector<2x4xf32>
      %21 = vector.multi_reduction <maximumf>, %20, %cst_26 [2] : vector<2x4x128xf32> to vector<2x4xf32>
      %c0_27 = arith.constant 0 : index
      %c0_28 = arith.constant 0 : index
      %22 = vector.load %arg3[%c0_27, %c0_28] : memref<4x8xf32, #tpu.memory_space<vmem>>, vector<4x8xf32>
      %c0_29 = arith.constant 0 : index
      %c0_30 = arith.constant 0 : index
      %23 = vector.load %arg4[%c0_29, %c0_30] : memref<1x8xf32, #tpu.memory_space<vmem>>, vector<1x8xf32>
      %c0_31 = arith.constant 0 : index
      %c0_32 = arith.constant 0 : index
      %24 = vector.load %arg5[%c0_31, %c0_32] : memref<8x4xf32, #tpu.memory_space<vmem>>, vector<8x4xf32>
      %c0_33 = arith.constant 0 : index
      %c0_34 = arith.constant 0 : index
      %25 = vector.load %arg6[%c0_33, %c0_34] : memref<1x4xf32, #tpu.memory_space<vmem>>, vector<1x4xf32>
      %26 = tpu.concatenate %19, %21 in 0 : vector<2x4xf32>, vector<2x4xf32> -> vector<4x4xf32>
      %cst_35 = arith.constant dense<0.000000e+00> : vector<4x8xf32>
      %27 = tpu.matmul %26, %22, %cst_35 {dimension_numbers = #tpu.dot_dimension_numbers<[1], [0], [0], [1], [0, 0, 1, 1], [], []>} : vector<4x4xf32>, vector<4x8xf32>, vector<4x8xf32> -> vector<4x8xf32>
      %28 = vector.broadcast %23 : vector<1x8xf32> to vector<4x8xf32>
      %29 = arith.addf %27, %28 : vector<4x8xf32>
      %cst_36 = arith.constant 0.000000e+00 : f32
      %30 = vector.broadcast %cst_36 : f32 to vector<4x8xf32>
      %31 = arith.maximumf %29, %30 : vector<4x8xf32>
      %cst_37 = arith.constant dense<0.000000e+00> : vector<4x4xf32>
      %32 = tpu.matmul %31, %24, %cst_37 {dimension_numbers = #tpu.dot_dimension_numbers<[1], [0], [0], [1], [0, 0, 1, 1], [], []>} : vector<4x8xf32>, vector<8x4xf32>, vector<4x4xf32> -> vector<4x4xf32>
      %33 = vector.broadcast %25 : vector<1x4xf32> to vector<4x4xf32>
      %34 = arith.addf %32, %33 : vector<4x4xf32>
      %35 = vector.extract_strided_slice %34 {offsets = [0, 0], sizes = [2, 4], strides = [1, 1]} : vector<4x4xf32> to vector<2x4xf32>
      %36 = vector.extract_strided_slice %34 {offsets = [2, 0], sizes = [2, 4], strides = [1, 1]} : vector<4x4xf32> to vector<2x4xf32>
      %37 = arith.addf %35, %36 : vector<2x4xf32>
      %38 = arith.negf %37 : vector<2x4xf32>
      %39 = math.exp %38 : vector<2x4xf32>
      %cst_38 = arith.constant 1.000000e+00 : f32
      %40 = vector.broadcast %cst_38 : f32 to vector<2x4xf32>
      %41 = arith.addf %40, %39 : vector<2x4xf32>
      %42 = arith.divf %40, %41 : vector<2x4xf32>
      %43 = vector.shape_cast %42 : vector<2x4xf32> to vector<2x1x4xf32>
      %c0_39 = arith.constant 0 : index
      %c0_40 = arith.constant 0 : index
      %c0_41 = arith.constant 0 : index
      %44 = vector.load %arg7[%c0_39, %c0_40, %c0_41] : memref<2x1x4xf32, #tpu.memory_space<vmem>>, vector<2x1x4xf32>
      tpu.vector_store %arg7[%c0_39, %c0_40, %c0_41], %43 {strides = array<i32>} : memref<2x1x4xf32, #tpu.memory_space<vmem>>, vector<2x1x4xf32>,
    } else {
    }
    return
  }
  func.func @transform_0(%arg0: i32, %arg1: i32) -> (i32, i32, i32) {
    %c0_i32 = arith.constant 0 : i32
    %c0_i32_0 = arith.constant 0 : i32
    return %arg0, %c0_i32, %arg1 : i32, i32, i32
  }
  func.func @transform_1(%arg0: i32, %arg1: i32) -> (i32, i32) {
    %c0_i32 = arith.constant 0 : i32
    %c0_i32_0 = arith.constant 0 : i32
    %c0_i32_1 = arith.constant 0 : i32
    return %c0_i32, %c0_i32_0 : i32, i32
  }
  func.func @transform_2(%arg0: i32, %arg1: i32) -> (i32, i32) {
    %c0_i32 = arith.constant 0 : i32
    %c0_i32_0 = arith.constant 0 : i32
    %c0_i32_1 = arith.constant 0 : i32
    return %c0_i32, %c0_i32_0 : i32, i32
  }
  func.func @transform_3(%arg0: i32, %arg1: i32) -> (i32, i32) {
    %c0_i32 = arith.constant 0 : i32
    %c0_i32_0 = arith.constant 0 : i32
    %c0_i32_1 = arith.constant 0 : i32
    return %c0_i32, %c0_i32_0 : i32, i32
  }
  func.func @transform_4(%arg0: i32, %arg1: i32) -> (i32, i32) {
    %c0_i32 = arith.constant 0 : i32
    %c0_i32_0 = arith.constant 0 : i32
    %c0_i32_1 = arith.constant 0 : i32
    return %c0_i32, %c0_i32_0 : i32, i32
  }
  func.func @transform_5(%arg0: i32, %arg1: i32) -> (i32, i32, i32) {
    %c0_i32 = arith.constant 0 : i32
    %c0_i32_0 = arith.constant 0 : i32
    %c0_i32_1 = arith.constant 0 : i32
    return %arg0, %c0_i32, %c0_i32_0 : i32, i32, i32
  }
}

</mosaic_0001>

<bundles_post_ra>
// kernel: tpu_custom_call.1
= control target key start
LH: loop header
LB: loop body
LE: loop exit
PB: predicated region body
PF: predicated region fallthrough
CT: control target
= control target key end

     0   :  { %10 = vsyncpa [#allocation5], 0  ;;  %s496_s0 = inlined_call_operand.hbm [shape: f32[2,4,256], index: 0, kind: input, shape index: {}]   ;;  %s497_s1 = inlined_call_operand.vmem [shape: f32[4,8], index: 1, kind: input, shape index: {}]   ;;  %s498_s2 = inlined_call_operand.vmem [shape: f32[1,8], index: 2, kind: input, shape index: {}]   ;;  %s499_s3 = inlined_call_operand.vmem [shape: f32[8,4], index: 3, kind: input, shape index: {}]   ;;  %s500_s4 = inlined_call_operand.vmem [shape: f32[1,4], index: 4, kind: input, shape index: {}]   ;;  %s501_s5 = inlined_call_operand.hbm [shape: f32[2,1,4], index: 5, kind: output, shape index: {}]  }
   0x1   :  { %11 = vsyncpa [#allocation6], 0  ;;  %s420_s18 = smov [#allocation4]   ;;  %s372_s22 = scalar_lea.hbm %s496_s0, 256 }
   0x2   :  { %s17_s19 = sshll.u32 %s420_s18, 4  ;;  %p373_p0 = scmp.ne.s32.totalorder %s496_s0, %s372_s22  ;;  %s18_s19 = int_to_ptr.vmem [resolvable:$true] %s17_s19 }
   0x3   :  { %p376_p1 = scmp.lt.u32.totalorder %s372_s22, %s496_s0 }
   0x5   :  { %p378_p2 = pnand %p376_p1, %p373_p0 }
   0x7   :  { %381 = shalt.err (!%p378_p2)
}
   0x8   :  { %s382_s27 = scalar_lea.vmem %s18_s19, 256  ;;  %p387_p4 = scmp.lt.s32.totalorder %s18_s19, %s18_s19 }
   0x9   :  { %p383_p3 = scmp.ne.s32.totalorder %s18_s19, %s382_s27  ;;  %p388_p5 = scmp.lt.s32.totalorder %s382_s27, %s382_s27 }
   0xb   :  { %p389_p6 = por %p388_p5, %p387_p4 }
   0xd   :  { %p390_p7 = pnand %p389_p6, %p383_p3 }
   0xf   :  { %393 = shalt.err (!%p390_p7)
}
  0x10   :  { %s421_s28 = smov 128   ;;  %s422_s29 = smov 8  }
  0x11   :  { %23 = dma.hbm_to_vmem [thread:$0]  %s496_s0, 256, %s18_s19, [#allocation5], %s421_s28, %s421_s28, %s422_s29  }
  0x12   :  { %416 = dma.done.wait [#allocation5], 256  }
  0x13   :  { %417 = vsyncadd [#allocation5], 4294967040  ;;  %v423_v0 = vmov -inf   ;;  %v424_v1 = vmov 0.0   ;;  %v47_v2 = vld [vmem:[#allocation4] sm:$0xf]  ;;  %v91_v27 = vlaneseq }
  0x14   :  { %41 = vst [vmem:[#allocation3] sm:$0xf] %v423_v0  ;;  %42 = vst [vmem:[#allocation3 + $0x4] sm:$0xf] %v423_v0  ;;  %348 = vmatprep.subr.mxu0 %v424_v1  ;;  %353 = vmatprep.subr.mxu1 %v424_v1  ;;  %v53_v3 = vld [vmem:[#allocation4 + $0x4] sm:$0xf] }
  0x15   :  { %39 = vst [vmem:[#allocation2] sm:$0xf] %v424_v1  ;;  %40 = vst [vmem:[#allocation2 + $0x4] sm:$0xf] %v424_v1  ;;  %v48_v4 = vld [vmem:[#allocation4 + $0x8] sm:$0xf] }
  0x16   :  { %v54_v11 = vld [vmem:[#allocation4 + $0xc] sm:$0xf]  ;;  %vm68_vm0 = vcmask 1043456   ;;  %v85_v26 = vld [vmem:[%s497_s1] sm:$0xf]  ;;  %vm425_vm1 = vmmov 0  }
  0x17   :  { %349 = vmatpush3.msk.msra.mxu0 %vm68_vm0, %v85_v26  ;;  %350 = vmatprep.mubr.msk.f32.mxu0 %vm425_vm1, %v424_v1  ;;  %v92_v28 = vand.u32 127, %v91_v27  ;;  %v94_v29 = vshrl.u32 %v91_v27, 7  ;;  %vm114_vm2 = vcmask 1043459   ;;  %vm101_vm3 = vcmask 1041409   ;;  %v87_v44 = vld [vmem:[%s499_s3] sm:$0xff] }
  0x18   :  { %355 = vmatprep.mubr.msk.f32.mxu1 %vm425_vm1, %v424_v1  ;;  %vm117_vm4 = vcmask 1041408   ;;  %vm125_vm5 = vcmask 31744   ;;  %354 = vmatpush3.msra.mxu1 %v87_v44  ;;  %v338_v45 = vld [vmem:[%s498_s2] ss:$0 sm:$0xff]  ;;  %vm209_vm6 = vcmask 64512   ;;  %s427_s2 = smov [#allocation7]  }
  0x19   :  { %v95_v32 = vsub.s32 %v92_v28, %v94_v29  ;;  %v341_v50 = vld [vmem:[%s500_s4] ss:$0 sm:$0xff]  ;;  %v426_v59 = vmov 1966171168   ;;  %s326_s3 = sshll.u32 %s427_s2, 4  ;;  %vm318_vm7 = vcmask 24576   ;;  %s327_s3 = int_to_ptr.vmem [resolvable:$true] %s326_s3 }
  0x1a   :  { %v295_v60 = vunpack.c.l.s4 %v426_v59  ;;  %s394_s4 = scalar_lea.vmem %s327_s3, 32  ;;  %p399_p9 = scmp.lt.s32.totalorder %s327_s3, %s327_s3 }
  0x1b   :  { %v45_v5 = vld [vmem:[#allocation3] sm:$0xf]  ;;  %v46_v7 = vld [vmem:[#allocation3 + $0x4] sm:$0xf]  ;;  %p395_p8 = scmp.ne.s32.totalorder %s327_s3, %s394_s4  ;;  %p400_p10 = scmp.lt.s32.totalorder %s394_s4, %s394_s4 }
  0x1c   :  { %v43_v6 = vld [vmem:[#allocation2] sm:$0xf]  ;;  %v51_v8 = vmax.f32 %v45_v5, %v47_v2  ;;  %v52_v10 = vmax.f32 %v46_v7, %v48_v4  ;;  %v44_v12 = vld [vmem:[#allocation2 + $0x4] sm:$0xf]  ;;  %v296_v61 = vunpack.c.0.s8 %v295_v60 }
  0x1d   :  { %v49_v9 = vadd.f32 %v47_v2, %v43_v6  ;;  %v50_v13 = vadd.f32 %v48_v4, %v44_v12  ;;  %p401_p11 = por %p400_p10, %p399_p9 }
  0x1e   :  { %v57_v14 = vmax.f32 %v51_v8, %v53_v3  ;;  %v58_v16 = vmax.f32 %v52_v10, %v54_v11  ;;  %v299_v62 = vsub.s32 %v296_v61, %v94_v29 }
  0x1f   :  { %v55_v15 = vadd.f32 %v53_v3, %v49_v9  ;;  %v56_v17 = vadd.f32 %v54_v11, %v50_v13  ;;  %p402_p12 = pnand %p401_p11, %p395_p8 }
  0x20   :  { %61 = vst [vmem:[#allocation3] sm:$0xf] %v57_v14  ;;  %62 = vst [vmem:[#allocation3 + $0x4] sm:$0xf] %v58_v16 }
  0x21   :  { %59 = vst [vmem:[#allocation2] sm:$0xf] %v55_v15  ;;  %60 = vst [vmem:[#allocation2 + $0x4] sm:$0xf] %v56_v17 }
  0x27   :  { %v77_v18 = vld [vmem:[#allocation3] sm:$0xf]  ;;  %v78_v20 = vld [vmem:[#allocation3 + $0x4] sm:$0xf] }
  0x28   :  { %v66_v19 = vld [vmem:[#allocation2] sm:$0xf]  ;;  %v79_v21 = vsel %vm68_vm0, %v77_v18, -inf  ;;  %v67_v23 = vld [vmem:[#allocation2 + $0x4] sm:$0xf]  ;;  %v82_v24 = vsel %vm68_vm0, %v78_v20, -inf }
  0x29   :  { %v69_v22 = vsel %vm68_vm0, %v66_v19, 0.0  ;;  %80 = vmax.xlane.f32.xlu1 %v79_v21  ;;  %v72_v25 = vsel %vm68_vm0, %v67_v23, 0.0 }
  0x2a   :  { %70 = vadd.xlane.f32.xlu0 %v69_v22 }
  0x2d   :  { %83 = vmax.xlane.f32.xlu1 %v82_v24 }
  0x2e   :  { %73 = vadd.xlane.f32.xlu0 %v72_v25 }
  0xb6   :  { %v81_v30 = vpop.xlane.xlu1 %80 }
  0xb7   :  { %v71_v31 = vpop.xlane.xlu0 %70  ;;  %v109_v38 = vrot.slane %v81_v30, %v95_v32 }
  0xb8   :  { %v75_v33 = vmul.f32 0.00390625, %v71_v31 }
  0xba   :  { %v84_v34 = vpop.xlane.xlu1 %83  ;;  %v96_v39 = vrot.slane %v75_v33, %v95_v32 }
  0xbb   :  { %v74_v35 = vpop.xlane.xlu0 %73  ;;  %v113_v36 = vrot.slane %v84_v34, %v95_v32 }
  0xbc   :  { %v76_v37 = vmul.f32 0.00390625, %v74_v35 }
  0xbd   :  { %v115_v41 = vsel %vm114_vm2, %v113_v36, %v109_v38 }
  0xbe   :  { %v100_v40 = vrot.slane %v76_v37, %v95_v32 }
  0xc0   :  { %v102_v42 = vsel %vm101_vm3, %v100_v40, %v96_v39 }
  0xc1   :  { %v118_v43 = vsel %vm117_vm4, %v102_v42, %v115_v41 }
  0xc2   :  { %351 = vmatmul.mubr.msk.f32.vlgmr.msra.gmra.mrb[0].mxu0 %vm125_vm5, %v118_v43 }
 0x195   :  { %v198_v46 = vpop.f32.mrb[0].mxu0 }
 0x196   :  { %v199_v47 = vadd.f32 %v338_v45, %v198_v46  ;;  %v352_v48 = vpop.f32.mrb[1].mxu0 }
 0x198   :  { %v202_v49 = vmax.f32 %v199_v47, 0.0 }
 0x19a   :  { %356 = vmatmul.mubr.msk.f32.vlgmr.msra.gmra.mrb[0].mxu1 %vm209_vm6, %v202_v49 }
 0x26d   :  { %v279_v51 = vpop.f32.mrb[0].mxu1 }
 0x26e   :  { %v280_v52 = vadd.f32 %v341_v50, %v279_v51  ;;  %v357_v53 = vpop.f32.mrb[1].mxu1 }
 0x270   :  { %v284_v54 = vrot.slane %v280_v52, 2 }
 0x272   :  { %v286_v55 = vadd.f32 %v284_v54, %v280_v52 }
 0x274   :  { %v343_v56 = vmul.f32 -1.442695, %v286_v55 }
 0x276   :  { %368 = vpow2.f32 %v343_v56 }
 0x280   :  { %v369_v57 = vpop.eup %368 }
 0x281   :  { %v290_v58 = vadd.f32 1.0, %v369_v57 }
 0x283   :  { %370 = vrcp.f32 %v290_v58 }
 0x28d   :  { %v371_v63 = vpop.eup %370 }
 0x28e   :  { %v300_v0 = vrot.slane %v371_v63, %v299_v62 }
 0x290   :  { %v301_v1 = vcombine.high %v300_v0, %v300_v0  ;;  %v308_v2 = vrot.slane %v300_v0, %v299_v62 }
 0x292   :  { %v315_v3 = vrot.slane %v301_v1, %v299_v62  ;;  %319 = vst.msk [vmem:[#allocation7] sm:$0x1] %vm318_vm7, %v308_v2 }
 0x294   :  { %320 = vst.msk [vmem:[#allocation7 + $0x1] sm:$0x1] %vm318_vm7, %v315_v3 }
 0x295   :  { %405 = shalt.err (!%p402_p12)
}
 0x296   :  { %s406_s15 = scalar_lea.hbm %s501_s5, 32 }
 0x297   :  { %p407_p13 = scmp.ne.s32.totalorder %s501_s5, %s406_s15  ;;  %p410_p0 = scmp.lt.u32.totalorder %s406_s15, %s501_s5 }
 0x299   :  { %p412_p1 = pnand %p410_p0, %p407_p13 }
 0x29b   :  { %415 = shalt.err (!%p412_p1)
}
 0x29c   :  { %s428_s20 = smov 16   ;;  %s429_s21 = smov 1  }
 0x29d   :  { %332 = dma.vmem_to_hbm [thread:$0]  %s327_s3, 32, %s501_s5, [#allocation6], %s428_s20, %s428_s20, %s429_s21  }
 0x29e   :  { %418 = dma.done.wait [#allocation6], 32  }
 0x29f   :  { %419 = vsyncadd [#allocation6], 4294967264 }
 0x2a0   :  { %336 = vsyncpa [#allocation5], 1 }
 0x2a1   :  { %337 = vsyncpa [#allocation6], 1 }

</bundles_post_ra>
